<compile_context>
chip_gen: v6e
topology: v6e:2x2x1
jax: 0.10.0
libtpu: 0.0.40
codegen_flags: <defaults>
</compile_context>

<pallas_src>
import functools
import math

import jax
import jax.numpy as jnp
import numpy as np
from jax.experimental import pallas as pl
from jax.experimental.pallas import tpu as pltpu

N_HEAD = 4
D_HEAD = 4                    # torch.matmul(q, k) requires d_head == n_head
D_MODEL = N_HEAD * D_HEAD     # d_all == d_model
NQ = 8
NK = 8                        # batched matmul over the leading dim requires nq == nk
DROPOUT_P = 0.1               # eval-mode dropout == identity


def mha_kernel(n_head, d_head, q_ref, k_ref, v_ref,
               wqb_ref, wkt_ref, wvt_ref, bmat_ref, seg_ref, o_ref):
    f32 = jnp.float32
    q_in = q_ref[...].astype(f32)
    k_in = k_ref[...].astype(f32)
    v_in = v_ref[...].astype(f32)

    # Stage 1: a[i, h*dh + j] = sum_m qp[i, h*dh+m] * kp[i, m*dh+j]
    # The column-broadcast of qp and the block-tiling of kp are folded into
    # the projection weights on the host (wqb[m] = Wq_perm/sqrt(dh) @ B_m,
    # wkt[m] = Wk_perm @ T_m), so each term is two tiny MXU matmuls plus one
    # full-width VPU multiply-add -- no lane slicing, no concatenates.
    a_all = None
    for m in range(d_head):
        qb = jnp.dot(q_in, wqb_ref[m].astype(f32), preferred_element_type=f32)
        kt = jnp.dot(k_in, wkt_ref[m].astype(f32), preferred_element_type=f32)
        term = qb * kt
        a_all = term if a_all is None else a_all + term

    # Batched softmax across heads.  A single per-row max is a valid
    # stabilizer for every head segment (constant per-row shift cancels).
    # The segmented (per-head) denominator is one small matmul against a
    # block-diagonal ones matrix (also replicating it across each head's
    # lanes).  Exact reciprocal (EUP) keeps 1e-4 accuracy.
    # NOTE: if one head's logits sat ~88 below the row max (not the case for
    # these inputs) its exp() would underflow; per-head max would be needed.
    a_all = a_all - jnp.max(a_all, axis=-1, keepdims=True)
    e_all = jnp.exp(a_all)                       # dropout(softmax) == softmax in eval
    denom = jnp.dot(e_all, seg_ref[...].astype(f32), preferred_element_type=f32)
    p_all = e_all * pl.reciprocal(denom, approx=False)

    # Stage 2: out[i, h*dh + e] = sum_j p[i, h*dh+j] * vpf[i, j*dh+e]
    # where vpf already contains the blockwise fc and the d_head scale
    # (wvt[j] = Wv_perm @ (d_head * kron(I, wfc.T)) @ T_j).  Same broadcast /
    # tile structure as stage 1; bmat[j] broadcasts p's column j of each head.
    c_all = None
    for j in range(d_head):
        pb = jnp.dot(p_all, bmat_ref[j].astype(f32), preferred_element_type=f32)
        vt = jnp.dot(v_in, wvt_ref[j].astype(f32), preferred_element_type=f32)
        term = pb * vt
        c_all = term if c_all is None else c_all + term

    o_ref[...] = c_all.astype(o_ref.dtype)


def multi_head_attention(q, k, v, wq, wk, wv, wfc):
    nq, d_model = q.shape
    n_head = wfc.shape[0]
    d_head = d_model // n_head
    assert d_head == n_head, "module semantics require d_head == n_head"
    f32 = jnp.float32

    def head_perm(w):
        # torch (out_features, in_features) weight -> (d_model, d_model) matrix
        # such that (x @ W_perm)[:, h*d_head + m] == (x @ w.T)[:, m*n_head + h],
        # i.e. the .view(nq, d_head, n_head).transpose(1, 2) head split becomes
        # a contiguous column layout.
        return jnp.transpose(
            jnp.transpose(w.reshape(d_head, n_head, d_model), (1, 0, 2))
            .reshape(d_model, d_model))

    eye_h = jnp.eye(n_head, dtype=f32)
    eye_d = jnp.eye(d_head, dtype=f32)
    ones_d = jnp.ones((d_head,), f32)
    ones_h = jnp.ones((n_head,), f32)

    def bcast_mat(m):
        # (x @ B_m)[:, h*dh + j] == x[:, h*dh + m]   (broadcast col m of each head)
        return jnp.kron(eye_h, jnp.outer(eye_d[m], ones_d))

    def tile_mat(m):
        # (x @ T_m)[:, h*dh + j] == x[:, m*dh + j]   (tile block m across heads)
        return jnp.kron(jnp.outer(eye_h[m], ones_h), eye_d)

    wq_p = head_perm(wq).astype(f32) * (1.0 / math.sqrt(d_head))  # fold 1/sqrt(dh)
    wk_p = head_perm(wk).astype(f32)
    wv_p = head_perm(wv).astype(f32)

    # Fold blockwise fc (and the "d_head *" factor) into the V projection.
    fc_blk = float(d_head) * jnp.kron(eye_h, jnp.transpose(wfc).astype(f32))
    wv_fold = wv_p @ fc_blk

    wqb = jnp.stack([wq_p @ bcast_mat(m) for m in range(d_head)])     # (dh, dm, dm)
    wkt = jnp.stack([wk_p @ tile_mat(m) for m in range(d_head)])      # (dh, dm, dm)
    wvt = jnp.stack([wv_fold @ tile_mat(j) for j in range(d_head)])   # (dh, dm, dm)
    bmats = jnp.stack([bcast_mat(j) for j in range(d_head)])          # (dh, dm, dm)

    # Block-diagonal ones: segmented (per-head) softmax denominator via one matmul.
    seg_mat = jnp.kron(eye_h, jnp.ones((d_head, d_head), f32))

    kernel = functools.partial(mha_kernel, n_head, d_head)
    return pl.pallas_call(
        kernel,
        out_shape=jax.ShapeDtypeStruct((nq, d_model), q.dtype),
        in_specs=[pl.BlockSpec(memory_space=pltpu.MemorySpace.VMEM)
                  for _ in range(8)],
        out_specs=pl.BlockSpec(memory_space=pltpu.MemorySpace.VMEM),
    )(q, k, v, wqb, wkt, wvt, bmats, seg_mat)


def reference(q, k, v, wq, wk, wv, wfc, n_head):
    """Pure-JAX mirror of the PyTorch forward (eval mode, blockwise fc)."""
    nq, d_model = q.shape
    nk = k.shape[0]
    d_head = d_model // n_head
    qp = q @ wq.T
    kp = k @ wk.T
    vp = v @ wv.T
    qh = qp.reshape(nq, d_head, n_head).transpose(0, 2, 1)
    kh = kp.reshape(nk, d_head, n_head).transpose(0, 2, 1)
    vh = vp.reshape(nk, d_head, n_head).transpose(0, 2, 1)
    a = jnp.einsum('ihm,imj->ihj', qh, kh) / math.sqrt(d_head)
    b = jax.nn.softmax(a, axis=-1)
    c = jnp.einsum('ihj,ijd->ihd', b, vh)
    d = d_head * c                              # (nq, n_head, d_head)
    out = jnp.einsum('ihm,jm->ihj', d, wfc)     # blockwise fc (d_head == n_head)
    return out.reshape(nq, d_model)


if __name__ == "__main__":
    key = jax.random.PRNGKey(0)
    kq, kk, kv, kwq, kwk, kwv, kwfc = jax.random.split(key, 7)

    q = jax.random.normal(kq, (NQ, D_MODEL), jnp.float32)
    k = jax.random.normal(kk, (NK, D_MODEL), jnp.float32)
    v = jax.random.normal(kv, (NK, D_MODEL), jnp.float32)

    # Deterministic weight init (PyTorch-style uniform bounds).
    bnd = 1.0 / math.sqrt(D_MODEL)
    wq = jax.random.uniform(kwq, (D_MODEL, D_MODEL), jnp.float32, -bnd, bnd)
    wk = jax.random.uniform(kwk, (D_MODEL, D_MODEL), jnp.float32, -bnd, bnd)
    wv = jax.random.uniform(kwv, (D_MODEL, D_MODEL), jnp.float32, -bnd, bnd)
    bfc = 1.0 / math.sqrt(N_HEAD)
    wfc = jax.random.uniform(kwfc, (N_HEAD, N_HEAD), jnp.float32, -bfc, bfc)

    out = multi_head_attention(q, k, v, wq, wk, wv, wfc)
    out = jax.block_until_ready(out)

    ref = reference(q, k, v, wq, wk, wv, wfc, N_HEAD)
    np.testing.assert_allclose(np.asarray(out), np.asarray(ref), rtol=1e-4, atol=1e-4)

    print("KERNEL_OK")
</pallas_src>

<mosaic_0001>
module attributes {stable_mosaic.version = 11 : i64} {
  func.func @mha_kernel(%arg0: memref<8x16xf32, #tpu.memory_space<vmem>>, %arg1: memref<8x16xf32, #tpu.memory_space<vmem>>, %arg2: memref<8x16xf32, #tpu.memory_space<vmem>>, %arg3: memref<4x16x16xf32, #tpu.memory_space<vmem>>, %arg4: memref<4x16x16xf32, #tpu.memory_space<vmem>>, %arg5: memref<4x16x16xf32, #tpu.memory_space<vmem>>, %arg6: memref<4x16x16xf32, #tpu.memory_space<vmem>>, %arg7: memref<16x16xf32, #tpu.memory_space<vmem>>, %arg8: memref<8x16xf32, #tpu.memory_space<vmem>>) attributes {dimension_semantics = [], scalar_prefetch = 0 : i64, scratch_operands = 0 : i64, tpu.core_type = #tpu.core_type<tc>} {
    %c0 = arith.constant 0 : index
    %c0_0 = arith.constant 0 : index
    %0 = vector.load %arg0[%c0, %c0_0] : memref<8x16xf32, #tpu.memory_space<vmem>>, vector<8x16xf32>
    %c0_1 = arith.constant 0 : index
    %c0_2 = arith.constant 0 : index
    %1 = vector.load %arg1[%c0_1, %c0_2] : memref<8x16xf32, #tpu.memory_space<vmem>>, vector<8x16xf32>
    %c0_3 = arith.constant 0 : index
    %c0_4 = arith.constant 0 : index
    %2 = vector.load %arg2[%c0_3, %c0_4] : memref<8x16xf32, #tpu.memory_space<vmem>>, vector<8x16xf32>
    %c0_5 = arith.constant 0 : index
    %c0_6 = arith.constant 0 : index
    %c0_7 = arith.constant 0 : index
    %3 = vector.load %arg3[%c0_5, %c0_6, %c0_7] : memref<4x16x16xf32, #tpu.memory_space<vmem>>, vector<1x16x16xf32>
    %4 = vector.shape_cast %3 : vector<1x16x16xf32> to vector<16x16xf32>
    %cst = arith.constant dense<0.000000e+00> : vector<8x16xf32>
    %5 = tpu.matmul %0, %4, %cst {dimension_numbers = #tpu.dot_dimension_numbers<[1], [0], [0], [1], [0, 0, 1, 1], [], []>} : vector<8x16xf32>, vector<16x16xf32>, vector<8x16xf32> -> vector<8x16xf32>
    %c0_8 = arith.constant 0 : index
    %c0_9 = arith.constant 0 : index
    %c0_10 = arith.constant 0 : index
    %6 = vector.load %arg4[%c0_8, %c0_9, %c0_10] : memref<4x16x16xf32, #tpu.memory_space<vmem>>, vector<1x16x16xf32>
    %7 = vector.shape_cast %6 : vector<1x16x16xf32> to vector<16x16xf32>
    %cst_11 = arith.constant dense<0.000000e+00> : vector<8x16xf32>
    %8 = tpu.matmul %1, %7, %cst_11 {dimension_numbers = #tpu.dot_dimension_numbers<[1], [0], [0], [1], [0, 0, 1, 1], [], []>} : vector<8x16xf32>, vector<16x16xf32>, vector<8x16xf32> -> vector<8x16xf32>
    %9 = arith.mulf %5, %8 : vector<8x16xf32>
    %c1 = arith.constant 1 : index
    %c0_12 = arith.constant 0 : index
    %c0_13 = arith.constant 0 : index
    %10 = vector.load %arg3[%c1, %c0_12, %c0_13] : memref<4x16x16xf32, #tpu.memory_space<vmem>>, vector<1x16x16xf32>
    %11 = vector.shape_cast %10 : vector<1x16x16xf32> to vector<16x16xf32>
    %cst_14 = arith.constant dense<0.000000e+00> : vector<8x16xf32>
    %12 = tpu.matmul %0, %11, %cst_14 {dimension_numbers = #tpu.dot_dimension_numbers<[1], [0], [0], [1], [0, 0, 1, 1], [], []>} : vector<8x16xf32>, vector<16x16xf32>, vector<8x16xf32> -> vector<8x16xf32>
    %c1_15 = arith.constant 1 : index
    %c0_16 = arith.constant 0 : index
    %c0_17 = arith.constant 0 : index
    %13 = vector.load %arg4[%c1_15, %c0_16, %c0_17] : memref<4x16x16xf32, #tpu.memory_space<vmem>>, vector<1x16x16xf32>
    %14 = vector.shape_cast %13 : vector<1x16x16xf32> to vector<16x16xf32>
    %cst_18 = arith.constant dense<0.000000e+00> : vector<8x16xf32>
    %15 = tpu.matmul %1, %14, %cst_18 {dimension_numbers = #tpu.dot_dimension_numbers<[1], [0], [0], [1], [0, 0, 1, 1], [], []>} : vector<8x16xf32>, vector<16x16xf32>, vector<8x16xf32> -> vector<8x16xf32>
    %16 = arith.mulf %12, %15 : vector<8x16xf32>
    %17 = arith.addf %9, %16 : vector<8x16xf32>
    %c2 = arith.constant 2 : index
    %c0_19 = arith.constant 0 : index
    %c0_20 = arith.constant 0 : index
    %18 = vector.load %arg3[%c2, %c0_19, %c0_20] : memref<4x16x16xf32, #tpu.memory_space<vmem>>, vector<1x16x16xf32>
    %19 = vector.shape_cast %18 : vector<1x16x16xf32> to vector<16x16xf32>
    %cst_21 = arith.constant dense<0.000000e+00> : vector<8x16xf32>
    %20 = tpu.matmul %0, %19, %cst_21 {dimension_numbers = #tpu.dot_dimension_numbers<[1], [0], [0], [1], [0, 0, 1, 1], [], []>} : vector<8x16xf32>, vector<16x16xf32>, vector<8x16xf32> -> vector<8x16xf32>
    %c2_22 = arith.constant 2 : index
    %c0_23 = arith.constant 0 : index
    %c0_24 = arith.constant 0 : index
    %21 = vector.load %arg4[%c2_22, %c0_23, %c0_24] : memref<4x16x16xf32, #tpu.memory_space<vmem>>, vector<1x16x16xf32>
    %22 = vector.shape_cast %21 : vector<1x16x16xf32> to vector<16x16xf32>
    %cst_25 = arith.constant dense<0.000000e+00> : vector<8x16xf32>
    %23 = tpu.matmul %1, %22, %cst_25 {dimension_numbers = #tpu.dot_dimension_numbers<[1], [0], [0], [1], [0, 0, 1, 1], [], []>} : vector<8x16xf32>, vector<16x16xf32>, vector<8x16xf32> -> vector<8x16xf32>
    %24 = arith.mulf %20, %23 : vector<8x16xf32>
    %25 = arith.addf %17, %24 : vector<8x16xf32>
    %c3 = arith.constant 3 : index
    %c0_26 = arith.constant 0 : index
    %c0_27 = arith.constant 0 : index
    %26 = vector.load %arg3[%c3, %c0_26, %c0_27] : memref<4x16x16xf32, #tpu.memory_space<vmem>>, vector<1x16x16xf32>
    %27 = vector.shape_cast %26 : vector<1x16x16xf32> to vector<16x16xf32>
    %cst_28 = arith.constant dense<0.000000e+00> : vector<8x16xf32>
    %28 = tpu.matmul %0, %27, %cst_28 {dimension_numbers = #tpu.dot_dimension_numbers<[1], [0], [0], [1], [0, 0, 1, 1], [], []>} : vector<8x16xf32>, vector<16x16xf32>, vector<8x16xf32> -> vector<8x16xf32>
    %c3_29 = arith.constant 3 : index
    %c0_30 = arith.constant 0 : index
    %c0_31 = arith.constant 0 : index
    %29 = vector.load %arg4[%c3_29, %c0_30, %c0_31] : memref<4x16x16xf32, #tpu.memory_space<vmem>>, vector<1x16x16xf32>
    %30 = vector.shape_cast %29 : vector<1x16x16xf32> to vector<16x16xf32>
    %cst_32 = arith.constant dense<0.000000e+00> : vector<8x16xf32>
    %31 = tpu.matmul %1, %30, %cst_32 {dimension_numbers = #tpu.dot_dimension_numbers<[1], [0], [0], [1], [0, 0, 1, 1], [], []>} : vector<8x16xf32>, vector<16x16xf32>, vector<8x16xf32> -> vector<8x16xf32>
    %32 = arith.mulf %28, %31 : vector<8x16xf32>
    %33 = arith.addf %25, %32 : vector<8x16xf32>
    %cst_33 = arith.constant dense<0xFF800000> : vector<8xf32>
    %34 = vector.multi_reduction <maximumf>, %33, %cst_33 [1] : vector<8x16xf32> to vector<8xf32>
    %35 = vector.shape_cast %34 : vector<8xf32> to vector<8x1xf32>
    %36 = vector.broadcast %35 : vector<8x1xf32> to vector<8x16xf32>
    %37 = arith.subf %33, %36 : vector<8x16xf32>
    %38 = math.exp %37 : vector<8x16xf32>
    %c0_34 = arith.constant 0 : index
    %c0_35 = arith.constant 0 : index
    %39 = vector.load %arg7[%c0_34, %c0_35] : memref<16x16xf32, #tpu.memory_space<vmem>>, vector<16x16xf32>
    %cst_36 = arith.constant dense<0.000000e+00> : vector<8x16xf32>
    %40 = tpu.matmul %38, %39, %cst_36 {dimension_numbers = #tpu.dot_dimension_numbers<[1], [0], [0], [1], [0, 0, 1, 1], [], []>} : vector<8x16xf32>, vector<16x16xf32>, vector<8x16xf32> -> vector<8x16xf32>
    %41 = tpu.reciprocal %40 : vector<8x16xf32> -> vector<8x16xf32>
    %42 = arith.mulf %38, %41 : vector<8x16xf32>
    %c0_37 = arith.constant 0 : index
    %c0_38 = arith.constant 0 : index
    %c0_39 = arith.constant 0 : index
    %43 = vector.load %arg6[%c0_37, %c0_38, %c0_39] : memref<4x16x16xf32, #tpu.memory_space<vmem>>, vector<1x16x16xf32>
    %44 = vector.shape_cast %43 : vector<1x16x16xf32> to vector<16x16xf32>
    %cst_40 = arith.constant dense<0.000000e+00> : vector<8x16xf32>
    %45 = tpu.matmul %42, %44, %cst_40 {dimension_numbers = #tpu.dot_dimension_numbers<[1], [0], [0], [1], [0, 0, 1, 1], [], []>} : vector<8x16xf32>, vector<16x16xf32>, vector<8x16xf32> -> vector<8x16xf32>
    %c0_41 = arith.constant 0 : index
    %c0_42 = arith.constant 0 : index
    %c0_43 = arith.constant 0 : index
    %46 = vector.load %arg5[%c0_41, %c0_42, %c0_43] : memref<4x16x16xf32, #tpu.memory_space<vmem>>, vector<1x16x16xf32>
    %47 = vector.shape_cast %46 : vector<1x16x16xf32> to vector<16x16xf32>
    %cst_44 = arith.constant dense<0.000000e+00> : vector<8x16xf32>
    %48 = tpu.matmul %2, %47, %cst_44 {dimension_numbers = #tpu.dot_dimension_numbers<[1], [0], [0], [1], [0, 0, 1, 1], [], []>} : vector<8x16xf32>, vector<16x16xf32>, vector<8x16xf32> -> vector<8x16xf32>
    %49 = arith.mulf %45, %48 : vector<8x16xf32>
    %c1_45 = arith.constant 1 : index
    %c0_46 = arith.constant 0 : index
    %c0_47 = arith.constant 0 : index
    %50 = vector.load %arg6[%c1_45, %c0_46, %c0_47] : memref<4x16x16xf32, #tpu.memory_space<vmem>>, vector<1x16x16xf32>
    %51 = vector.shape_cast %50 : vector<1x16x16xf32> to vector<16x16xf32>
    %cst_48 = arith.constant dense<0.000000e+00> : vector<8x16xf32>
    %52 = tpu.matmul %42, %51, %cst_48 {dimension_numbers = #tpu.dot_dimension_numbers<[1], [0], [0], [1], [0, 0, 1, 1], [], []>} : vector<8x16xf32>, vector<16x16xf32>, vector<8x16xf32> -> vector<8x16xf32>
    %c1_49 = arith.constant 1 : index
    %c0_50 = arith.constant 0 : index
    %c0_51 = arith.constant 0 : index
    %53 = vector.load %arg5[%c1_49, %c0_50, %c0_51] : memref<4x16x16xf32, #tpu.memory_space<vmem>>, vector<1x16x16xf32>
    %54 = vector.shape_cast %53 : vector<1x16x16xf32> to vector<16x16xf32>
    %cst_52 = arith.constant dense<0.000000e+00> : vector<8x16xf32>
    %55 = tpu.matmul %2, %54, %cst_52 {dimension_numbers = #tpu.dot_dimension_numbers<[1], [0], [0], [1], [0, 0, 1, 1], [], []>} : vector<8x16xf32>, vector<16x16xf32>, vector<8x16xf32> -> vector<8x16xf32>
    %56 = arith.mulf %52, %55 : vector<8x16xf32>
    %57 = arith.addf %49, %56 : vector<8x16xf32>
    %c2_53 = arith.constant 2 : index
    %c0_54 = arith.constant 0 : index
    %c0_55 = arith.constant 0 : index
    %58 = vector.load %arg6[%c2_53, %c0_54, %c0_55] : memref<4x16x16xf32, #tpu.memory_space<vmem>>, vector<1x16x16xf32>
    %59 = vector.shape_cast %58 : vector<1x16x16xf32> to vector<16x16xf32>
    %cst_56 = arith.constant dense<0.000000e+00> : vector<8x16xf32>
    %60 = tpu.matmul %42, %59, %cst_56 {dimension_numbers = #tpu.dot_dimension_numbers<[1], [0], [0], [1], [0, 0, 1, 1], [], []>} : vector<8x16xf32>, vector<16x16xf32>, vector<8x16xf32> -> vector<8x16xf32>
    %c2_57 = arith.constant 2 : index
    %c0_58 = arith.constant 0 : index
    %c0_59 = arith.constant 0 : index
    %61 = vector.load %arg5[%c2_57, %c0_58, %c0_59] : memref<4x16x16xf32, #tpu.memory_space<vmem>>, vector<1x16x16xf32>
    %62 = vector.shape_cast %61 : vector<1x16x16xf32> to vector<16x16xf32>
    %cst_60 = arith.constant dense<0.000000e+00> : vector<8x16xf32>
    %63 = tpu.matmul %2, %62, %cst_60 {dimension_numbers = #tpu.dot_dimension_numbers<[1], [0], [0], [1], [0, 0, 1, 1], [], []>} : vector<8x16xf32>, vector<16x16xf32>, vector<8x16xf32> -> vector<8x16xf32>
    %64 = arith.mulf %60, %63 : vector<8x16xf32>
    %65 = arith.addf %57, %64 : vector<8x16xf32>
    %c3_61 = arith.constant 3 : index
    %c0_62 = arith.constant 0 : index
    %c0_63 = arith.constant 0 : index
    %66 = vector.load %arg6[%c3_61, %c0_62, %c0_63] : memref<4x16x16xf32, #tpu.memory_space<vmem>>, vector<1x16x16xf32>
    %67 = vector.shape_cast %66 : vector<1x16x16xf32> to vector<16x16xf32>
    %cst_64 = arith.constant dense<0.000000e+00> : vector<8x16xf32>
    %68 = tpu.matmul %42, %67, %cst_64 {dimension_numbers = #tpu.dot_dimension_numbers<[1], [0], [0], [1], [0, 0, 1, 1], [], []>} : vector<8x16xf32>, vector<16x16xf32>, vector<8x16xf32> -> vector<8x16xf32>
    %c3_65 = arith.constant 3 : index
    %c0_66 = arith.constant 0 : index
    %c0_67 = arith.constant 0 : index
    %69 = vector.load %arg5[%c3_65, %c0_66, %c0_67] : memref<4x16x16xf32, #tpu.memory_space<vmem>>, vector<1x16x16xf32>
    %70 = vector.shape_cast %69 : vector<1x16x16xf32> to vector<16x16xf32>
    %cst_68 = arith.constant dense<0.000000e+00> : vector<8x16xf32>
    %71 = tpu.matmul %2, %70, %cst_68 {dimension_numbers = #tpu.dot_dimension_numbers<[1], [0], [0], [1], [0, 0, 1, 1], [], []>} : vector<8x16xf32>, vector<16x16xf32>, vector<8x16xf32> -> vector<8x16xf32>
    %72 = arith.mulf %68, %71 : vector<8x16xf32>
    %73 = arith.addf %65, %72 : vector<8x16xf32>
    %c0_69 = arith.constant 0 : index
    %c0_70 = arith.constant 0 : index
    %74 = vector.load %arg8[%c0_69, %c0_70] : memref<8x16xf32, #tpu.memory_space<vmem>>, vector<8x16xf32>
    tpu.vector_store %arg8[%c0_69, %c0_70], %73 {strides = array<i32>} : memref<8x16xf32, #tpu.memory_space<vmem>>, vector<8x16xf32>,
    return
  }
}

</mosaic_0001>

<bundles_post_ra>
// kernel: tpu_custom_call.1
= control target key start
LH: loop header
LB: loop body
LE: loop exit
PB: predicated region body
PF: predicated region fallthrough
CT: control target
= control target key end

     0   :  { %13 = vsyncpa [#allocation3], 0  ;;  %s2013_s0 = inlined_call_operand.hbm [shape: f32[8,16], index: 0, kind: input, shape index: {}]   ;;  %s2014_s1 = inlined_call_operand.hbm [shape: f32[8,16], index: 1, kind: input, shape index: {}]   ;;  %s2015_s2 = inlined_call_operand.hbm [shape: f32[8,16], index: 2, kind: input, shape index: {}]   ;;  %s2016_s3 = inlined_call_operand.hbm [shape: f32[4,16,16], index: 3, kind: input, shape index: {}]   ;;  %s2017_s4 = inlined_call_operand.hbm [shape: f32[4,16,16], index: 4, kind: input, shape index: {}]   ;;  %s2018_s5 = inlined_call_operand.hbm [shape: f32[4,16,16], index: 5, kind: input, shape index: {}]   ;;  %s2019_s6 = inlined_call_operand.hbm [shape: f32[4,16,16], index: 6, kind: input, shape index: {}]   ;;  %s2020_s7 = inlined_call_operand.hbm [shape: f32[16,16], index: 7, kind: input, shape index: {}]   ;;  %s2021_s8 = inlined_call_operand.hbm [shape: f32[8,16], index: 8, kind: output, shape index: {}]  }
   0x1   :  { %14 = vsyncpa [#allocation6], 0 }
   0x2   :  { %15 = vsyncpa [#allocation9], 0 }
   0x3   :  { %16 = vsyncpa [#allocation12], 0 }
   0x4   :  { %17 = vsyncpa [#allocation15], 0 }
   0x5   :  { %18 = vsyncpa [#allocation4], 0  ;;  %s1826_s27 = smov [#allocation5]   ;;  %s1827_s29 = smov [#allocation8]  }
   0x6   :  { %s35_s28 = sshll.u32 %s1826_s27, 4  ;;  %s54_s30 = sshll.u32 %s1827_s29, 4  ;;  %s36_s28 = int_to_ptr.vmem [resolvable:$true] %s35_s28  ;;  %s55_s30 = int_to_ptr.vmem [resolvable:$true] %s54_s30 }
   0x7   :  { %s1642_s9 = scalar_lea.vmem %s36_s28, 128  ;;  %p1647_p1 = scmp.lt.s32.totalorder %s36_s28, %s36_s28 }
   0x8   :  { %p1643_p0 = scmp.ne.s32.totalorder %s36_s28, %s1642_s9  ;;  %p1648_p2 = scmp.lt.s32.totalorder %s1642_s9, %s1642_s9 }
   0xa   :  { %p1649_p3 = por %p1648_p2, %p1647_p1 }
   0xc   :  { %p1650_p4 = pnand %p1649_p3, %p1643_p0 }
   0xe   :  { %1653 = shalt.err (!%p1650_p4)
}
   0xf   :  { %38 = dma.hbm_to_vmem [thread:$0]  %s2014_s1, 128, %s36_s28, [#allocation6]  }
  0x10   :  { %s1662_s12 = scalar_lea.vmem %s55_s30, 1024  ;;  %p1667_p6 = scmp.lt.s32.totalorder %s55_s30, %s55_s30 }
  0x11   :  { %p1663_p5 = scmp.ne.s32.totalorder %s55_s30, %s1662_s12  ;;  %p1668_p7 = scmp.lt.s32.totalorder %s1662_s12, %s1662_s12 }
  0x13   :  { %p1669_p8 = por %p1668_p7, %p1667_p6 }
  0x15   :  { %p1670_p9 = pnand %p1669_p8, %p1663_p5 }
  0x17   :  { %1673 = shalt.err (!%p1670_p9)
}
  0x18   :  { %s1828_s13 = smov 128   ;;  %s1829_s14 = smov 8  }
  0x19   :  { %60 = dma.hbm_to_vmem [thread:$0]  %s2016_s3, 1024, %s55_s30, [#allocation9], %s1828_s13, %s1828_s13, %s1829_s14  }
  0x1a   :  { %s1830_s17 = smov [#allocation11]   ;;  %s1831_s19 = smov [#allocation2]  }
  0x1b   :  { %s78_s18 = sshll.u32 %s1830_s17, 4  ;;  %s25_s1 = sshll.u32 %s1831_s19, 4  ;;  %s79_s18 = int_to_ptr.vmem [resolvable:$true] %s78_s18  ;;  %s26_s1 = int_to_ptr.vmem [resolvable:$true] %s25_s1 }
  0x1c   :  { %s1682_s20 = scalar_lea.vmem %s79_s18, 1024  ;;  %p1687_p11 = scmp.lt.s32.totalorder %s79_s18, %s79_s18 }
  0x1d   :  { %p1683_p10 = scmp.ne.s32.totalorder %s79_s18, %s1682_s20  ;;  %p1688_p12 = scmp.lt.s32.totalorder %s1682_s20, %s1682_s20 }
  0x1f   :  { %p1689_p13 = por %p1688_p12, %p1687_p11 }
  0x21   :  { %p1690_p0 = pnand %p1689_p13, %p1683_p10 }
  0x23   :  { %1693 = shalt.err (!%p1690_p0)
}
  0x24   :  { %84 = dma.hbm_to_vmem [thread:$0]  %s2018_s5, 1024, %s79_s18, [#allocation12], %s1828_s13, %s1828_s13, %s1829_s14  }
  0x25   :  { %s1702_s3 = scalar_lea.vmem %s26_s1, 128  ;;  %p1707_p2 = scmp.lt.s32.totalorder %s26_s1, %s26_s1 }
  0x26   :  { %p1703_p1 = scmp.ne.s32.totalorder %s26_s1, %s1702_s3  ;;  %p1708_p3 = scmp.lt.s32.totalorder %s1702_s3, %s1702_s3 }
  0x28   :  { %p1709_p4 = por %p1708_p3, %p1707_p2 }
  0x2a   :  { %p1710_p5 = pnand %p1709_p4, %p1703_p1 }
  0x2c   :  { %1713 = shalt.err (!%p1710_p5)
}
  0x2d   :  { %28 = dma.hbm_to_vmem [thread:$0]  %s2013_s0, 128, %s26_s1, [#allocation3]  }
  0x2e   :  { %s1832_s25 = smov [#allocation7]   ;;  %s1833_s27 = smov [#allocation10]  }
  0x2f   :  { %s45_s26 = sshll.u32 %s1832_s25, 4  ;;  %s66_s28 = sshll.u32 %s1833_s27, 4  ;;  %s46_s26 = int_to_ptr.vmem [resolvable:$true] %s45_s26  ;;  %s67_s28 = int_to_ptr.vmem [resolvable:$true] %s66_s28 }
  0x30   :  { %s1722_s29 = scalar_lea.vmem %s46_s26, 128  ;;  %p1727_p7 = scmp.lt.s32.totalorder %s46_s26, %s46_s26 }
  0x31   :  { %p1723_p6 = scmp.ne.s32.totalorder %s46_s26, %s1722_s29  ;;  %p1728_p8 = scmp.lt.s32.totalorder %s1722_s29, %s1722_s29 }
  0x33   :  { %p1729_p9 = por %p1728_p8, %p1727_p7 }
  0x35   :  { %p1730_p10 = pnand %p1729_p9, %p1723_p6 }
  0x37   :  { %1733 = shalt.err (!%p1730_p10)
}
  0x38   :  { %48 = dma.hbm_to_vmem [thread:$0]  %s2015_s2, 128, %s46_s26, [#allocation6]  }
  0x39   :  { %s1742_s9 = scalar_lea.vmem %s67_s28, 1024  ;;  %p1747_p12 = scmp.lt.s32.totalorder %s67_s28, %s67_s28 }
  0x3a   :  { %p1743_p11 = scmp.ne.s32.totalorder %s67_s28, %s1742_s9  ;;  %p1748_p13 = scmp.lt.s32.totalorder %s1742_s9, %s1742_s9 }
  0x3c   :  { %p1749_p0 = por %p1748_p13, %p1747_p12 }
  0x3e   :  { %p1750_p1 = pnand %p1749_p0, %p1743_p11 }
  0x40   :  { %1753 = shalt.err (!%p1750_p1)
}
  0x41   :  { %72 = dma.hbm_to_vmem [thread:$0]  %s2017_s4, 1024, %s67_s28, [#allocation9], %s1828_s13, %s1828_s13, %s1829_s14  }
  0x42   :  { %s1834_s11 = smov [#allocation13]   ;;  %s1835_s15 = smov [#allocation14]  }
  0x43   :  { %s90_s12 = sshll.u32 %s1834_s11, 4  ;;  %s102_s16 = sshll.u32 %s1835_s15, 4  ;;  %s91_s12 = int_to_ptr.vmem [resolvable:$true] %s90_s12  ;;  %s103_s16 = int_to_ptr.vmem [resolvable:$true] %s102_s16 }
  0x44   :  { %s1762_s2 = scalar_lea.vmem %s91_s12, 1024  ;;  %p1767_p3 = scmp.lt.s32.totalorder %s91_s12, %s91_s12 }
  0x45   :  { %p1763_p2 = scmp.ne.s32.totalorder %s91_s12, %s1762_s2  ;;  %p1768_p4 = scmp.lt.s32.totalorder %s1762_s2, %s1762_s2 }
  0x47   :  { %p1769_p5 = por %p1768_p4, %p1767_p3 }
  0x49   :  { %p1770_p6 = pnand %p1769_p5, %p1763_p2 }
  0x4b   :  { %1773 = shalt.err (!%p1770_p6)
}
  0x4c   :  { %96 = dma.hbm_to_vmem [thread:$0]  %s2019_s6, 1024, %s91_s12, [#allocation12], %s1828_s13, %s1828_s13, %s1829_s14  }
  0x4d   :  { %s1782_s4 = scalar_lea.vmem %s103_s16, 256  ;;  %p1787_p8 = scmp.lt.s32.totalorder %s103_s16, %s103_s16 }
  0x4e   :  { %p1783_p7 = scmp.ne.s32.totalorder %s103_s16, %s1782_s4  ;;  %p1788_p9 = scmp.lt.s32.totalorder %s1782_s4, %s1782_s4 }
  0x50   :  { %p1789_p10 = por %p1788_p9, %p1787_p8 }
  0x52   :  { %p1790_p11 = pnand %p1789_p10, %p1783_p7 }
  0x54   :  { %1793 = shalt.err (!%p1790_p11)
}
  0x55   :  { %108 = dma.hbm_to_vmem [thread:$0]  %s2020_s7, 256, %s103_s16, [#allocation15], %s1828_s13, %s1828_s13, %s1829_s14  }
  0x56   :  { %1814 = dma.done.wait [#allocation3], 128  }
  0x57   :  { %1815 = vsyncadd [#allocation3], 4294967168 }
  0x58   :  { %1816 = dma.done.wait [#allocation6], 256  }
  0x59   :  { %1817 = vsyncadd [#allocation6], 4294967040 }
  0x5a   :  { %1818 = dma.done.wait [#allocation9], 2048  }
  0x5b   :  { %1819 = vsyncadd [#allocation9], 4294965248 }
  0x5c   :  { %1820 = dma.done.wait [#allocation12], 2048  }
  0x5d   :  { %1821 = vsyncadd [#allocation12], 4294965248 }
  0x5e   :  { %1822 = dma.done.wait [#allocation15], 256  }
  0x5f   :  { %1823 = vsyncadd [#allocation15], 4294967040  ;;  %v1836_v0 = vmov 0.0   ;;  %vm1837_vm0 = vmmov 0   ;;  %v137_v1 = vld [vmem:[#allocation8 + $0x8] sm:$0xff]  ;;  %v136_v3 = vld [vmem:[#allocation8] sm:$0xff] }
  0x60   :  { %1498 = vmatprep.subr.mxu0 %v1836_v0  ;;  %1505 = vmatprep.subr.mxu1 %v1836_v0  ;;  %v213_v2 = vld [vmem:[#allocation10 + $0x8] sm:$0xff]  ;;  %v212_v4 = vld [vmem:[#allocation10] sm:$0xff]  ;;  %vm138_vm1 = vcmask 130048   ;;  %v134_v6 = vld [vmem:[#allocation5] sm:$0xff]  ;;  %s1838_s6 = smov [#allocation16]  }
  0x61   :  { %1502 = vmatprep.mubr.msk.f32.mxu0 %vm1837_vm0, %v1836_v0  ;;  %1509 = vmatprep.mubr.msk.f32.mxu1 %vm1837_vm0, %v1836_v0  ;;  %v133_v5 = vld [vmem:[#allocation2] sm:$0xff]  ;;  %v290_v7 = vld [vmem:[#allocation8 + $0x18] sm:$0xff]  ;;  %v289_v9 = vld [vmem:[#allocation8 + $0x10] sm:$0xff]  ;;  %s1417_s7 = sshll.u32 %s1838_s6, 4  ;;  %s1418_s7 = int_to_ptr.vmem [resolvable:$true] %s1417_s7 }
  0x62   :  { %1499 = vmatpush3.msra.mxu0 %v137_v1  ;;  %1506 = vmatpush3.msra.mxu1 %v213_v2  ;;  %v363_v8 = vld [vmem:[#allocation10 + $0x18] sm:$0xff]  ;;  %v362_v10 = vld [vmem:[#allocation10 + $0x10] sm:$0xff]  ;;  %v438_v11 = vld [vmem:[#allocation8 + $0x28] sm:$0xff]  ;;  %s1794_s13 = scalar_lea.vmem %s1418_s7, 128  ;;  %p1799_p13 = scmp.lt.s32.totalorder %s1418_s7, %s1418_s7 }
  0x63   :  { %1500 = vmatprep.subr.mxu0 %v1836_v0  ;;  %1507 = vmatprep.subr.mxu1 %v1836_v0  ;;  %v511_v12 = vld [vmem:[#allocation10 + $0x28] sm:$0xff]  ;;  %v437_v13 = vld [vmem:[#allocation8 + $0x20] sm:$0xff]  ;;  %v586_v15 = vld [vmem:[#allocation8 + $0x38] sm:$0xff]  ;;  %p1795_p12 = scmp.ne.s32.totalorder %s1418_s7, %s1794_s13  ;;  %p1800_p0 = scmp.lt.s32.totalorder %s1794_s13, %s1794_s13 }
  0x64   :  { %1501 = vmatpush3.msra.mxu0 %v136_v3  ;;  %1508 = vmatpush3.msra.mxu1 %v212_v4  ;;  %v510_v14 = vld [vmem:[#allocation10 + $0x20] sm:$0xff]  ;;  %v659_v16 = vld [vmem:[#allocation10 + $0x38] sm:$0xff]  ;;  %v585_v17 = vld [vmem:[#allocation8 + $0x30] sm:$0xff] }
  0x65   :  { %1503 = vmatmul.mubr.msk.f32.vlgmr.msra.gmra.mxu0 %vm138_vm1, %v133_v5  ;;  %1510 = vmatmul.mubr.msk.f32.vlgmr.msra.gmra.mxu1 %vm138_vm1, %v134_v6  ;;  %v658_v18 = vld [vmem:[#allocation10 + $0x30] sm:$0xff]  ;;  %v739_v43 = vld [vmem:[#allocation14 + $0x8] sm:$0xff]  ;;  %v738_v44 = vld [vmem:[#allocation14] sm:$0xff]  ;;  %p1801_p1 = por %p1800_p0, %p1799_p13 }
  0x66   :  { %1512 = vmatprep.subr.mxu0 %v1836_v0  ;;  %1519 = vmatprep.subr.mxu1 %v1836_v0  ;;  %v891_v49 = vld [vmem:[#allocation11 + $0x8] sm:$0xff]  ;;  %v890_v51 = vld [vmem:[#allocation11] sm:$0xff]  ;;  %v135_v53 = vld [vmem:[#allocation7] sm:$0xff] }
  0x67   :  { %1513 = vmatpush3.msra.mxu0 %v290_v7  ;;  %1520 = vmatpush3.msra.mxu1 %v363_v8  ;;  %v816_v50 = vld [vmem:[#allocation13 + $0x8] sm:$0xff]  ;;  %v815_v52 = vld [vmem:[#allocation13] sm:$0xff]  ;;  %v1041_v54 = vld [vmem:[#allocation11 + $0x18] sm:$0xff]  ;;  %p1802_p2 = pnand %p1801_p1, %p1795_p12 }
  0x68   :  { %1514 = vmatprep.subr.mxu0 %v1836_v0  ;;  %1521 = vmatprep.subr.mxu1 %v1836_v0  ;;  %v1040_v55 = vld [vmem:[#allocation11 + $0x10] sm:$0xff]  ;;  %v1189_v56 = vld [vmem:[#allocation11 + $0x28] sm:$0xff]  ;;  %v1188_v57 = vld [vmem:[#allocation11 + $0x20] sm:$0xff] }
  0x69   :  { %1515 = vmatpush3.msra.mxu0 %v289_v9  ;;  %1516 = vmatprep.mubr.msk.f32.mxu0 %vm1837_vm0, %v1836_v0  ;;  %v1337_v58 = vld [vmem:[#allocation11 + $0x38] sm:$0xff]  ;;  %v1336_v59 = vld [vmem:[#allocation11 + $0x30] sm:$0xff]  ;;  %v1116_v3 = vld [vmem:[#allocation13 + $0x28] sm:$0xff] }
  0x6a   :  { %1522 = vmatpush3.msra.mxu1 %v362_v10  ;;  %1523 = vmatprep.mubr.msk.f32.mxu1 %vm1837_vm0, %v1836_v0  ;;  %v968_v1 = vld [vmem:[#allocation13 + $0x18] sm:$0xff]  ;;  %v967_v2 = vld [vmem:[#allocation13 + $0x10] sm:$0xff]  ;;  %v1115_v4 = vld [vmem:[#allocation13 + $0x20] sm:$0xff] }
  0x6b   :  { %1517 = vmatmul.mubr.msk.f32.vlgmr.msra.gmra.mxu0 %vm138_vm1, %v133_v5  ;;  %1524 = vmatmul.mubr.msk.f32.vlgmr.msra.gmra.mxu1 %vm138_vm1, %v134_v6 }
  0x6c   :  { %1526 = vmatprep.subr.mxu0 %v1836_v0  ;;  %1533 = vmatprep.subr.mxu1 %v1836_v0 }
  0x6d   :  { %1527 = vmatpush3.msra.mxu0 %v438_v11  ;;  %1534 = vmatpush3.msra.mxu1 %v511_v12 }
  0x6e   :  { %1528 = vmatprep.subr.mxu0 %v1836_v0  ;;  %1535 = vmatprep.subr.mxu1 %v1836_v0 }
  0x6f   :  { %1529 = vmatpush3.msra.mxu0 %v437_v13  ;;  %1530 = vmatprep.mubr.msk.f32.mxu0 %vm1837_vm0, %v1836_v0 }
  0x70   :  { %1536 = vmatpush3.msra.mxu1 %v510_v14  ;;  %1537 = vmatprep.mubr.msk.f32.mxu1 %vm1837_vm0, %v1836_v0 }
  0x71   :  { %1531 = vmatmul.mubr.msk.f32.vlgmr.msra.gmra.mxu0 %vm138_vm1, %v133_v5  ;;  %1538 = vmatmul.mubr.msk.f32.vlgmr.msra.gmra.mxu1 %vm138_vm1, %v134_v6 }
  0x72   :  { %1540 = vmatprep.subr.mxu0 %v1836_v0  ;;  %1547 = vmatprep.subr.mxu1 %v1836_v0 }
  0x73   :  { %1541 = vmatpush3.msra.mxu0 %v586_v15  ;;  %1548 = vmatpush3.msra.mxu1 %v659_v16 }
  0x74   :  { %1542 = vmatprep.subr.mxu0 %v1836_v0  ;;  %1549 = vmatprep.subr.mxu1 %v1836_v0 }
  0x75   :  { %1543 = vmatpush3.msra.mxu0 %v585_v17  ;;  %1544 = vmatprep.mubr.msk.f32.mxu0 %vm1837_vm0, %v1836_v0 }
  0x76   :  { %1550 = vmatpush3.msra.mxu1 %v658_v18  ;;  %1551 = vmatprep.mubr.msk.f32.mxu1 %vm1837_vm0, %v1836_v0 }
  0x77   :  { %1545 = vmatmul.mubr.msk.f32.vlgmr.msra.gmra.mxu0 %vm138_vm1, %v133_v5  ;;  %1552 = vmatmul.mubr.msk.f32.vlgmr.msra.gmra.mxu1 %vm138_vm1, %v134_v6  ;;  %v1264_v5 = vld [vmem:[#allocation13 + $0x38] sm:$0xff]  ;;  %v1263_v6 = vld [vmem:[#allocation13 + $0x30] sm:$0xff] }
  0x78   :  { %1554 = vmatprep.subr.mxu0 %v1836_v0  ;;  %1558 = vmatprep.mubr.msk.f32.mxu0 %vm1837_vm0, %v1836_v0 }
  0x79   :  { %1561 = vmatprep.subr.mxu1 %v1836_v0  ;;  %1565 = vmatprep.mubr.msk.f32.mxu1 %vm1837_vm0, %v1836_v0 }
  0x7a   :  { %1555 = vmatpush3.msra.mxu0 %v739_v43  ;;  %1562 = vmatpush3.msra.mxu1 %v816_v50 }
  0x7b   :  { %1556 = vmatprep.subr.mxu0 %v1836_v0  ;;  %1563 = vmatprep.subr.mxu1 %v1836_v0 }
  0x7c   :  { %1557 = vmatpush3.msra.mxu0 %v738_v44  ;;  %1564 = vmatpush3.msra.mxu1 %v815_v52 }
  0x7d   :  { %1568 = vmatprep.subr.mxu0 %v1836_v0  ;;  %1575 = vmatprep.subr.mxu1 %v1836_v0 }
 0x125   :  { %v208_v19 = vpop.f32.mrf.mxu0  ;;  %v283_v20 = vpop.f32.mrf.mxu1 }
 0x126   :  { %v287_v32 = vmul.f32 %v283_v20, %v208_v19 }
 0x127   :  { %v1504_v21 = vpop.f32.mrf.mxu0  ;;  %v1511_v22 = vpop.f32.mrf.mxu1 }
 0x12b   :  { %v357_v23 = vpop.f32.mrf.mxu0  ;;  %v430_v24 = vpop.f32.mrf.mxu1 }
 0x12c   :  { %v434_v29 = vmul.f32 %v430_v24, %v357_v23 }
 0x12d   :  { %v1518_v25 = vpop.f32.mrf.mxu0  ;;  %v1525_v26 = vpop.f32.mrf.mxu1 }
 0x12e   :  { %v435_v34 = vadd.f32 %v434_v29, %v287_v32 }
 0x131   :  { %v505_v27 = vpop.f32.mrf.mxu0  ;;  %v578_v28 = vpop.f32.mrf.mxu1 }
 0x132   :  { %v582_v33 = vmul.f32 %v578_v28, %v505_v27 }
 0x133   :  { %v1532_v30 = vpop.f32.mrf.mxu0  ;;  %v1539_v31 = vpop.f32.mrf.mxu1 }
 0x134   :  { %v583_v37 = vadd.f32 %v582_v33, %v435_v34 }
 0x137   :  { %v653_v35 = vpop.f32.mrf.mxu0  ;;  %v726_v36 = vpop.f32.mrf.mxu1 }
 0x138   :  { %v730_v38 = vmul.f32 %v726_v36, %v653_v35 }
 0x139   :  { %v1546_v39 = vpop.f32.mrf.mxu0  ;;  %v1553_v40 = vpop.f32.mrf.mxu1 }
 0x13a   :  { %v731_v41 = vadd.f32 %v730_v38, %v583_v37 }
 0x13c   :  { %v732_v42 = vsel %vm138_vm1, %v731_v41, -inf }
 0x13d   :  { %733 = vmax.xlane.f32.xlu0 %v732_v42 }
 0x1c6   :  { %v734_v45 = vpop.xlane.xlu0 %733 }
 0x1c7   :  { %v735_v46 = vsub.f32 %v731_v41, %v734_v45 }
 0x1c9   :  { %v736_v47 = vmul.f32 1.442695, %v735_v46 }
 0x1cb   :  { %1630 = vpow2.f32 %v736_v47 }
 0x1d8   :  { %v1631_v48 = vpop.eup %1630 }
 0x1d9   :  { %1559 = vmatmul.mubr.msk.f32.vlgmr.msra.gmra.mxu0 %vm138_vm1, %v1631_v48 }
 0x1da   :  { %1572 = vmatprep.mubr.msk.f32.mxu0 %vm1837_vm0, %v1836_v0  ;;  %1569 = vmatpush3.msra.mxu0 %v891_v49 }
 0x1db   :  { %1570 = vmatprep.subr.mxu0 %v1836_v0 }
 0x1dc   :  { %1571 = vmatpush3.msra.mxu0 %v890_v51 }
 0x1dd   :  { %1573 = vmatmul.mubr.msk.f32.vlgmr.msra.gmra.mxu0 %vm138_vm1, %v135_v53  ;;  %1582 = vmatprep.subr.mxu0 %v1836_v0 }
 0x1de   :  { %1586 = vmatprep.mubr.msk.f32.mxu0 %vm1837_vm0, %v1836_v0  ;;  %1583 = vmatpush3.msra.mxu0 %v1041_v54 }
 0x1df   :  { %1584 = vmatprep.subr.mxu0 %v1836_v0 }
 0x1e0   :  { %1585 = vmatpush3.msra.mxu0 %v1040_v55 }
 0x1e1   :  { %1587 = vmatmul.mubr.msk.f32.vlgmr.msra.gmra.mxu0 %vm138_vm1, %v135_v53  ;;  %1596 = vmatprep.subr.mxu0 %v1836_v0 }
 0x1e2   :  { %1597 = vmatpush3.msra.mxu0 %v1189_v56  ;;  %1600 = vmatprep.mubr.msk.f32.mxu0 %vm1837_vm0, %v1836_v0 }
 0x1e3   :  { %1598 = vmatprep.subr.mxu0 %v1836_v0 }
 0x1e4   :  { %1599 = vmatpush3.msra.mxu0 %v1188_v57 }
 0x1e5   :  { %1601 = vmatmul.mubr.msk.f32.vlgmr.msra.gmra.mxu0 %vm138_vm1, %v135_v53  ;;  %1610 = vmatprep.subr.mxu0 %v1836_v0 }
 0x1e6   :  { %1611 = vmatpush3.msra.mxu0 %v1337_v58  ;;  %1614 = vmatprep.mubr.msk.f32.mxu0 %vm1837_vm0, %v1836_v0 }
 0x1e7   :  { %1612 = vmatprep.subr.mxu0 %v1836_v0 }
 0x1e8   :  { %1613 = vmatpush3.msra.mxu0 %v1336_v59 }
 0x1e9   :  { %1615 = vmatmul.mubr.msk.f32.vlgmr.msra.gmra.mxu0 %vm138_vm1, %v135_v53 }
 0x299   :  { %v809_v60 = vpop.f32.mrf.mxu0 }
 0x29a   :  { %1632 = vrcp.f32 %v809_v60 }
 0x29b   :  { %v1560_v61 = vpop.f32.mrf.mxu0 }
 0x29d   :  { %v961_v7 = vpop.f32.mrf.mxu0 }
 0x29f   :  { %v1574_v8 = vpop.f32.mrf.mxu0 }
 0x2a1   :  { %v1108_v9 = vpop.f32.mrf.mxu0 }
 0x2a3   :  { %v1588_v10 = vpop.f32.mrf.mxu0 }
 0x2a5   :  { %v1256_v11 = vpop.f32.mrf.mxu0 }
 0x2a7   :  { %v1633_v62 = vpop.eup %1632  ;;  %v1602_v12 = vpop.f32.mrf.mxu0 }
 0x2a8   :  { %v814_v63 = vmul.f32 %v1633_v62, %v1631_v48 }
 0x2a9   :  { %v1404_v13 = vpop.f32.mrf.mxu0 }
 0x2aa   :  { %1566 = vmatmul.mubr.msk.f32.vlgmr.msra.gmra.mxu1 %vm138_vm1, %v814_v63 }
 0x2ab   :  { %1576 = vmatpush3.msra.mxu1 %v968_v1  ;;  %1579 = vmatprep.mubr.msk.f32.mxu1 %vm1837_vm0, %v1836_v0  ;;  %v1616_v14 = vpop.f32.mrf.mxu0 }
 0x2ac   :  { %1577 = vmatprep.subr.mxu1 %v1836_v0 }
 0x2ad   :  { %1578 = vmatpush3.msra.mxu1 %v967_v2 }
 0x2ae   :  { %1580 = vmatmul.mubr.msk.f32.vlgmr.msra.gmra.mxu1 %vm138_vm1, %v814_v63  ;;  %1589 = vmatprep.subr.mxu1 %v1836_v0 }
 0x2af   :  { %1590 = vmatpush3.msra.mxu1 %v1116_v3  ;;  %1593 = vmatprep.mubr.msk.f32.mxu1 %vm1837_vm0, %v1836_v0 }
 0x2b0   :  { %1591 = vmatprep.subr.mxu1 %v1836_v0 }
 0x2b1   :  { %1592 = vmatpush3.msra.mxu1 %v1115_v4 }
 0x2b2   :  { %1594 = vmatmul.mubr.msk.f32.vlgmr.msra.gmra.mxu1 %vm138_vm1, %v814_v63  ;;  %1603 = vmatprep.subr.mxu1 %v1836_v0 }
 0x2b3   :  { %1604 = vmatpush3.msra.mxu1 %v1264_v5  ;;  %1607 = vmatprep.mubr.msk.f32.mxu1 %vm1837_vm0, %v1836_v0 }
 0x2b4   :  { %1605 = vmatprep.subr.mxu1 %v1836_v0 }
 0x2b5   :  { %1606 = vmatpush3.msra.mxu1 %v1263_v6 }
 0x2b6   :  { %1608 = vmatmul.mubr.msk.f32.vlgmr.msra.gmra.mxu1 %vm138_vm1, %v814_v63 }
 0x36a   :  { %v886_v15 = vpop.f32.mrf.mxu1 }
 0x36b   :  { %v965_v21 = vmul.f32 %v961_v7, %v886_v15 }
 0x36c   :  { %v1567_v16 = vpop.f32.mrf.mxu1 }
 0x36e   :  { %v1035_v17 = vpop.f32.mrf.mxu1 }
 0x36f   :  { %v1112_v19 = vmul.f32 %v1108_v9, %v1035_v17 }
 0x370   :  { %v1581_v18 = vpop.f32.mrf.mxu1 }
 0x371   :  { %v1113_v23 = vadd.f32 %v1112_v19, %v965_v21 }
 0x372   :  { %v1183_v20 = vpop.f32.mrf.mxu1 }
 0x373   :  { %v1260_v22 = vmul.f32 %v1256_v11, %v1183_v20 }
 0x374   :  { %v1595_v0 = vpop.f32.mrf.mxu1 }
 0x375   :  { %v1261_v25 = vadd.f32 %v1260_v22, %v1113_v23 }
 0x376   :  { %v1331_v24 = vpop.f32.mrf.mxu1 }
 0x377   :  { %v1408_v26 = vmul.f32 %v1404_v13, %v1331_v24 }
 0x378   :  { %v1609_v27 = vpop.f32.mrf.mxu1 }
 0x379   :  { %v1409_v28 = vadd.f32 %v1408_v26, %v1261_v25 }
 0x37b   :  { %1410 = vst.msk [vmem:[#allocation16] sm:$0xff] %vm138_vm1, %v1409_v28 }
 0x37c   :  { %1805 = shalt.err (!%p1802_p2)
}
 0x37d   :  { %1420 = dma.vmem_to_hbm [thread:$0]  %s1418_s7, 128, %s2021_s8, [#allocation4]  }
 0x37e   :  { %1824 = dma.done.wait [#allocation4], 128  }
 0x37f   :  { %1825 = vsyncadd [#allocation4], 4294967168 }
 0x380   :  { %1424 = vsyncpa [#allocation3], 1 }
 0x381   :  { %1425 = vsyncpa [#allocation6], 1 }
 0x382   :  { %1426 = vsyncpa [#allocation9], 1 }
 0x383   :  { %1427 = vsyncpa [#allocation12], 1 }
 0x384   :  { %1428 = vsyncpa [#allocation15], 1 }
 0x385   :  { %1429 = vsyncpa [#allocation4], 1 }

</bundles_post_ra>
